<compile_context>
chip_gen: v7x
topology: tpu7x:2x2x1
jax: 0.10.0
libtpu: 0.0.40
codegen_flags: <defaults>
</compile_context>

<pallas_src>
import jax
import jax.numpy as jnp
from jax.experimental import pallas as pl
from jax.experimental.pallas import tpu as pltpu

HIDDEN = 128            # fc1/fc2 width fixed by the PyTorch module
TILE_B_CAP = 1024       # rows per grid step upper bound (VMEM-safe everywhere)
MIN_PALLAS_BATCH = 256  # below this, XLA beats the pallas_call launch overhead


def _round_up(n, m):
    return ((n + m - 1) // m) * m


def _choose_tile_b(batch):
    """~Half the batch per tile (>= 2 grid steps so "parallel" can shard across
    both TensorCores on v7x), multiple of 8 sublanes, capped for VMEM safety."""
    target = max(8, _round_up((batch + 1) // 2, 8))
    return min(TILE_B_CAP, target)


def dqn_kernel(x_ref, w1_ref, b1_ref, w2_ref, b2_ref, w3_ref, b3_ref, o_ref):
    # Fused fc1 -> ReLU -> fc2 -> ReLU -> fc3 on one (tile_b, in_dim) batch tile.
    # x arrives f32 straight from HBM; the bf16 cast for the MXU is a free VPU
    # op. Accumulation, bias add and ReLU stay f32 (safe on v5e's f32-only VPU).
    x = x_ref[...].astype(jnp.bfloat16)                      # (tile_b, in_dim)
    h1 = jnp.dot(x, w1_ref[...], preferred_element_type=jnp.float32) + b1_ref[...]
    h1 = jnp.maximum(h1, 0.0).astype(jnp.bfloat16)
    h2 = jnp.dot(h1, w2_ref[...], preferred_element_type=jnp.float32) + b2_ref[...]
    h2 = jnp.maximum(h2, 0.0).astype(jnp.bfloat16)
    # Narrow f32 store (tile_b, out_dim): masked vst, but ~16x less HBM write
    # traffic than a 128-lane-padded output; store-slot slack is enormous here.
    o_ref[...] = (
        jnp.dot(h2, w3_ref[...], preferred_element_type=jnp.float32) + b3_ref[...]
    )


def dqn_forward(x, params, *, force_pallas=False):
    """x: (batch, input_dim) f32. Returns (batch, output_dim) f32 Q-values."""
    batch, in_dim = x.shape
    w1, b1 = params["w1"], params["b1"]
    w2, b2 = params["w2"], params["b2"]
    w3, b3 = params["w3"], params["b3"]
    out_dim = w3.shape[1]

    if batch < MIN_PALLAS_BATCH and not force_pallas:
        # Tiny single-step inference: launch-overhead bound; let XLA fuse it.
        return dqn_reference(x, params)

    tile_b = _choose_tile_b(batch)
    padded_batch = _round_up(batch, tile_b)
    # Only pad when the batch is ragged; padded rows are discarded at the end.
    x_in = x if padded_batch == batch else jnp.pad(
        x, ((0, padded_batch - batch), (0, 0)))

    grid = (padded_batch // tile_b,)

    def resident(shape):
        # Same block every grid step -> weight/bias stays parked in VMEM.
        return pl.BlockSpec(shape, lambda i: (0, 0))

    weight_bytes = sum(int(a.size) * a.dtype.itemsize
                       for a in (w1, b1, w2, b2, w3, b3))
    cost = pl.CostEstimate(
        flops=2 * padded_batch * (in_dim * HIDDEN + HIDDEN * HIDDEN + HIDDEN * out_dim),
        transcendentals=0,
        bytes_accessed=(padded_batch * in_dim * 4            # x read (f32)
                        + padded_batch * out_dim * 4          # out write (f32)
                        + weight_bytes),
    )

    out = pl.pallas_call(
        dqn_kernel,
        out_shape=jax.ShapeDtypeStruct((padded_batch, out_dim), jnp.float32),
        grid=grid,
        in_specs=[
            pl.BlockSpec((tile_b, in_dim), lambda i: (i, 0)),   # x: streamed tiles
            resident((in_dim, HIDDEN)),                         # w1
            resident((1, HIDDEN)),                              # b1
            resident((HIDDEN, HIDDEN)),                         # w2
            resident((1, HIDDEN)),                              # b2
            resident((HIDDEN, out_dim)),                        # w3
            resident((1, out_dim)),                             # b3
        ],
        out_specs=pl.BlockSpec((tile_b, out_dim), lambda i: (i, 0)),
        compiler_params=pltpu.CompilerParams(
            # Independent batch tiles: shard across both TCs on v7x megacore.
            dimension_semantics=("parallel",),
            # Weights ~70 KiB + double-buffered x/out tiles + intermediates stay
            # far below this on every generation (v7x physical VMEM = 64 MiB).
            vmem_limit_bytes=32 * 1024 * 1024,
        ),
        cost_estimate=cost,
    )(x_in, w1, b1, w2, b2, w3, b3)

    return out if padded_batch == batch else out[:batch]


def init_dqn_params(key, input_dim, output_dim):
    """Mimics nn.Linear's U(-1/sqrt(fan_in), 1/sqrt(fan_in)) init.

    Weights are stored as (in_features, out_features) bf16 (MXU-native) so the
    kernel computes x @ W + b, matching PyTorch's x @ W.T + b. Biases stay f32
    and 2D (1, out) for lane-major broadcasting. No lane padding of fc3: the
    output block's last dim equals the full array dim, keeping stores narrow.
    """
    ks = jax.random.split(key, 6)

    def linear(kw, kb, fan_in, fan_out):
        bound = 1.0 / (fan_in ** 0.5)
        w = jax.random.uniform(kw, (fan_in, fan_out), jnp.float32, -bound, bound)
        b = jax.random.uniform(kb, (1, fan_out), jnp.float32, -bound, bound)
        return w.astype(jnp.bfloat16), b

    w1, b1 = linear(ks[0], ks[1], input_dim, HIDDEN)
    w2, b2 = linear(ks[2], ks[3], HIDDEN, HIDDEN)
    w3, b3 = linear(ks[4], ks[5], HIDDEN, output_dim)
    return {"w1": w1, "b1": b1, "w2": w2, "b2": b2, "w3": w3, "b3": b3}


def dqn_reference(x, params):
    """Pure-JAX reference (f32 math on the stored weights)."""
    w1 = params["w1"].astype(jnp.float32)
    w2 = params["w2"].astype(jnp.float32)
    w3 = params["w3"].astype(jnp.float32)
    h1 = jnp.maximum(x @ w1 + params["b1"], 0.0)
    h2 = jnp.maximum(h1 @ w2 + params["b2"], 0.0)
    return h2 @ w3 + params["b3"]


if __name__ == "__main__":
    key = jax.random.PRNGKey(0)
    k_param, k_x = jax.random.split(key)

    # batch=300: above the pallas dispatch threshold, exercises a 2-step grid
    # (tile_b=152) AND the batch-remainder padding path (padded to 304 rows).
    batch, input_dim, output_dim = 300, 16, 8
    params = init_dqn_params(k_param, input_dim, output_dim)
    x = jax.random.normal(k_x, (batch, input_dim), jnp.float32)

    out = dqn_forward(x, params)
    out = jax.block_until_ready(out)

    ref = dqn_reference(x, params)
    assert out.shape == (batch, output_dim), out.shape
    # bf16 matmul operands with f32 accumulation -> loosened tolerance.
    assert jnp.allclose(out, ref, atol=5e-2, rtol=5e-2), "mismatch vs reference"

    print("KERNEL_OK")
</pallas_src>

<mosaic_0001>
module attributes {stable_mosaic.version = 11 : i64} {
  func.func @dqn_kernel(%arg0: i32, %arg1: memref<152x16xf32, #tpu.memory_space<vmem>>, %arg2: memref<16x128xbf16, #tpu.memory_space<vmem>>, %arg3: memref<1x128xf32, #tpu.memory_space<vmem>>, %arg4: memref<128x128xbf16, #tpu.memory_space<vmem>>, %arg5: memref<1x128xf32, #tpu.memory_space<vmem>>, %arg6: memref<128x8xbf16, #tpu.memory_space<vmem>>, %arg7: memref<1x8xf32, #tpu.memory_space<vmem>>, %arg8: memref<152x8xf32, #tpu.memory_space<vmem>>) attributes {dimension_semantics = [#tpu.dimension_semantics<parallel>], iteration_bounds = array<i64: 2>, scalar_prefetch = 0 : i64, scratch_operands = 0 : i64, tpu.core_type = #tpu.core_type<tc>, window_params = [{transform_indices = @transform_0, window_bounds = array<i64: 152, 16>}, {pipeline_mode = #tpu.pipeline_mode<synchronous>, transform_indices = @transform_1, window_bounds = array<i64: 16, 128>}, {pipeline_mode = #tpu.pipeline_mode<synchronous>, transform_indices = @transform_2, window_bounds = array<i64: 1, 128>}, {pipeline_mode = #tpu.pipeline_mode<synchronous>, transform_indices = @transform_3, window_bounds = array<i64: 128, 128>}, {pipeline_mode = #tpu.pipeline_mode<synchronous>, transform_indices = @transform_4, window_bounds = array<i64: 1, 128>}, {pipeline_mode = #tpu.pipeline_mode<synchronous>, transform_indices = @transform_5, window_bounds = array<i64: 128, 8>}, {pipeline_mode = #tpu.pipeline_mode<synchronous>, transform_indices = @transform_6, window_bounds = array<i64: 1, 8>}, {transform_indices = @transform_7, window_bounds = array<i64: 152, 8>}]} {
    %c0 = arith.constant 0 : index
    %c0_0 = arith.constant 0 : index
    %0 = vector.load %arg1[%c0, %c0_0] : memref<152x16xf32, #tpu.memory_space<vmem>>, vector<152x16xf32>
    %1 = arith.truncf %0 : vector<152x16xf32> to vector<152x16xbf16>
    %c0_1 = arith.constant 0 : index
    %c0_2 = arith.constant 0 : index
    %2 = vector.load %arg2[%c0_1, %c0_2] : memref<16x128xbf16, #tpu.memory_space<vmem>>, vector<16x128xbf16>
    %cst = arith.constant dense<0.000000e+00> : vector<152x128xf32>
    %3 = tpu.matmul %1, %2, %cst {dimension_numbers = #tpu.dot_dimension_numbers<[1], [0], [0], [1], [0, 0, 1, 1], [], []>} : vector<152x16xbf16>, vector<16x128xbf16>, vector<152x128xf32> -> vector<152x128xf32>
    %c0_3 = arith.constant 0 : index
    %c0_4 = arith.constant 0 : index
    %4 = vector.load %arg3[%c0_3, %c0_4] : memref<1x128xf32, #tpu.memory_space<vmem>>, vector<1x128xf32>
    %5 = vector.broadcast %4 : vector<1x128xf32> to vector<152x128xf32>
    %6 = arith.addf %3, %5 : vector<152x128xf32>
    %cst_5 = arith.constant 0.000000e+00 : f32
    %7 = vector.broadcast %cst_5 : f32 to vector<152x128xf32>
    %8 = arith.maximumf %6, %7 : vector<152x128xf32>
    %9 = arith.truncf %8 : vector<152x128xf32> to vector<152x128xbf16>
    %c0_6 = arith.constant 0 : index
    %c0_7 = arith.constant 0 : index
    %10 = vector.load %arg4[%c0_6, %c0_7] : memref<128x128xbf16, #tpu.memory_space<vmem>>, vector<128x128xbf16>
    %cst_8 = arith.constant dense<0.000000e+00> : vector<152x128xf32>
    %11 = tpu.matmul %9, %10, %cst_8 {dimension_numbers = #tpu.dot_dimension_numbers<[1], [0], [0], [1], [0, 0, 1, 1], [], []>} : vector<152x128xbf16>, vector<128x128xbf16>, vector<152x128xf32> -> vector<152x128xf32>
    %c0_9 = arith.constant 0 : index
    %c0_10 = arith.constant 0 : index
    %12 = vector.load %arg5[%c0_9, %c0_10] : memref<1x128xf32, #tpu.memory_space<vmem>>, vector<1x128xf32>
    %13 = vector.broadcast %12 : vector<1x128xf32> to vector<152x128xf32>
    %14 = arith.addf %11, %13 : vector<152x128xf32>
    %cst_11 = arith.constant 0.000000e+00 : f32
    %15 = vector.broadcast %cst_11 : f32 to vector<152x128xf32>
    %16 = arith.maximumf %14, %15 : vector<152x128xf32>
    %17 = arith.truncf %16 : vector<152x128xf32> to vector<152x128xbf16>
    %c0_12 = arith.constant 0 : index
    %c0_13 = arith.constant 0 : index
    %18 = vector.load %arg6[%c0_12, %c0_13] : memref<128x8xbf16, #tpu.memory_space<vmem>>, vector<128x8xbf16>
    %cst_14 = arith.constant dense<0.000000e+00> : vector<152x8xf32>
    %19 = tpu.matmul %17, %18, %cst_14 {dimension_numbers = #tpu.dot_dimension_numbers<[1], [0], [0], [1], [0, 0, 1, 1], [], []>} : vector<152x128xbf16>, vector<128x8xbf16>, vector<152x8xf32> -> vector<152x8xf32>
    %c0_15 = arith.constant 0 : index
    %c0_16 = arith.constant 0 : index
    %20 = vector.load %arg7[%c0_15, %c0_16] : memref<1x8xf32, #tpu.memory_space<vmem>>, vector<1x8xf32>
    %21 = vector.broadcast %20 : vector<1x8xf32> to vector<152x8xf32>
    %22 = arith.addf %19, %21 : vector<152x8xf32>
    %c0_17 = arith.constant 0 : index
    %c0_18 = arith.constant 0 : index
    %23 = vector.load %arg8[%c0_17, %c0_18] : memref<152x8xf32, #tpu.memory_space<vmem>>, vector<152x8xf32>
    tpu.vector_store %arg8[%c0_17, %c0_18], %22 {strides = array<i32>} : memref<152x8xf32, #tpu.memory_space<vmem>>, vector<152x8xf32>,
    return
  }
  func.func @transform_0(%arg0: i32) -> (i32, i32) {
    %c0_i32 = arith.constant 0 : i32
    %c0_i32_0 = arith.constant 0 : i32
    return %arg0, %c0_i32 : i32, i32
  }
  func.func @transform_1(%arg0: i32) -> (i32, i32) {
    %c0_i32 = arith.constant 0 : i32
    %c0_i32_0 = arith.constant 0 : i32
    %c0_i32_1 = arith.constant 0 : i32
    return %c0_i32, %c0_i32_0 : i32, i32
  }
  func.func @transform_2(%arg0: i32) -> (i32, i32) {
    %c0_i32 = arith.constant 0 : i32
    %c0_i32_0 = arith.constant 0 : i32
    %c0_i32_1 = arith.constant 0 : i32
    return %c0_i32, %c0_i32_0 : i32, i32
  }
  func.func @transform_3(%arg0: i32) -> (i32, i32) {
    %c0_i32 = arith.constant 0 : i32
    %c0_i32_0 = arith.constant 0 : i32
    %c0_i32_1 = arith.constant 0 : i32
    return %c0_i32, %c0_i32_0 : i32, i32
  }
  func.func @transform_4(%arg0: i32) -> (i32, i32) {
    %c0_i32 = arith.constant 0 : i32
    %c0_i32_0 = arith.constant 0 : i32
    %c0_i32_1 = arith.constant 0 : i32
    return %c0_i32, %c0_i32_0 : i32, i32
  }
  func.func @transform_5(%arg0: i32) -> (i32, i32) {
    %c0_i32 = arith.constant 0 : i32
    %c0_i32_0 = arith.constant 0 : i32
    %c0_i32_1 = arith.constant 0 : i32
    return %c0_i32, %c0_i32_0 : i32, i32
  }
  func.func @transform_6(%arg0: i32) -> (i32, i32) {
    %c0_i32 = arith.constant 0 : i32
    %c0_i32_0 = arith.constant 0 : i32
    %c0_i32_1 = arith.constant 0 : i32
    return %c0_i32, %c0_i32_0 : i32, i32
  }
  func.func @transform_7(%arg0: i32) -> (i32, i32) {
    %c0_i32 = arith.constant 0 : i32
    %c0_i32_0 = arith.constant 0 : i32
    return %arg0, %c0_i32 : i32, i32
  }
}

</mosaic_0001>

<bundles_post_ra>
// kernel: tpu_custom_call.1
= control target key start
LH: loop header
LB: loop body
LE: loop exit
PB: predicated region body
PF: predicated region fallthrough
CT: control target
= control target key end

     0   :  { %s1225_s24 = smov 0   ;;  %s1422_s0 = inlined_call_operand.vmem [shape: f32[304,16], index: 0, kind: input, shape index: {}]   ;;  %s1423_s1 = inlined_call_operand.vmem [shape: bf16[16,128], index: 1, kind: input, shape index: {}]   ;;  %s1424_s2 = inlined_call_operand.vmem [shape: f32[1,128], index: 2, kind: input, shape index: {}]   ;;  %s1425_s3 = inlined_call_operand.vmem [shape: bf16[128,128], index: 3, kind: input, shape index: {}]   ;;  %s1426_s4 = inlined_call_operand.vmem [shape: f32[1,128], index: 4, kind: input, shape index: {}]   ;;  %s1427_s5 = inlined_call_operand.vmem [shape: bf16[128,8], index: 5, kind: input, shape index: {}]   ;;  %s1428_s6 = inlined_call_operand.vmem [shape: f32[1,8], index: 6, kind: input, shape index: {}]   ;;  %s1429_s7 = inlined_call_operand.vmem [shape: f32[304,8], index: 7, kind: output, shape index: {}]  }
   0x1 LB: > { %s970_s25 = sadd.s32 4294967295, %s1183_s24   ;;  %p974_p0 = scmp.ge.s32.totalorder %s1183_s24, 1  ;;  %s1183_s24 = sphi %s1225_s24, %s17_s24  }
   0x2   : > { %p238_p1 = scmp.lt.s32.totalorder %s1183_s24, 3 }
   0x4   : > { %p239_p2 = pnand %p974_p0, %p238_p1 }
   0x5   : > { %v1160_v0 = vld [vmem:[%s1423_s1] sm:$0xff] (!%p239_p2)   ;;  %s270_s28 = smul.u32 (!%p239_p2), 19, %s970_s25  ;;  %vm327_vm0 = vcmask (!%p239_p2), 130048   ;;  %v1162_v17 = vld [vmem:[%s1425_s3 + $0x8] sm:$0xff] (!%p239_p2)   ;;  %v1163_v23 = vld [vmem:[%s1425_s3 + $0x10] sm:$0xff] (!%p239_p2)   ;;  %vm894_vm1 = vcmask (!%p239_p2), 64512  }
   0x6   : > { %242 = sbr.rel (%p239_p2) target bundleno = 714 (0x2ca), region = 48  ;;  %v1161_v1 = vld [vmem:[%s1425_s3] sm:$0xff] (!%p239_p2)   ;;  %1056 = vmatprep.subr.bf16.mxu0 (!%p239_p2), %v1160_v0  ;;  %1150 = vmatprep.subr.bf16.mxu1 (!%p239_p2), %v1160_v0  ;;  %v1164_v28 = vld [vmem:[%s1425_s3 + $0x18] sm:$0xff] (!%p239_p2)   ;;  %v1166_v34 = vld [vmem:[%s1425_s3 + $0x28] sm:$0xff] (!%p239_p2)  }
   0x7   : > { %p271_p3 = scmp.lt.s32.totalorder (!%p239_p2), %s270_s28, 37  ;;  %1057 = vmatpush3.bf16.msra.mxu0 (!%p239_p2), %v1160_v0  ;;  %1151 = vmatpush3.bf16.msra.mxu1 (!%p239_p2), %v1160_v0  ;;  %v1165_v31 = vld [vmem:[%s1425_s3 + $0x20] sm:$0xff] (!%p239_p2)   ;;  %v1167_v36 = vld [vmem:[%s1425_s3 + $0x30] sm:$0xff] (!%p239_p2)   ;;  %v1168_v37 = vld [vmem:[%s1425_s3 + $0x38] sm:$0xff] (!%p239_p2)  }
   0x8   : > { %1078 = vmatprep.subr.bf16.mxu1 (!%p239_p2), %v1161_v1  ;;  %v1169_v38 = vld [vmem:[%s1427_s5] sm:$0xff] (!%p239_p2)   ;;  %v1170_v39 = vld [vmem:[%s1427_s5 + $0x8] sm:$0xff] (!%p239_p2)   ;;  %v1171_v40 = vld [vmem:[%s1427_s5 + $0x10] sm:$0xff] (!%p239_p2)  }
   0x9   : > { %1114 = vmatprep.subr.bf16.mxu0 (!%p239_p2), %v1169_v38  ;;  %v1172_v41 = vld [vmem:[%s1427_s5 + $0x18] sm:$0xff] (!%p239_p2)   ;;  %v1173_v42 = vld [vmem:[%s1427_s5 + $0x20] sm:$0xff] (!%p239_p2)   ;;  %v1174_v43 = vld [vmem:[%s1427_s5 + $0x28] sm:$0xff] (!%p239_p2)  }
   0xa   : > { %v1320_v44 = vld [vmem:[%s1424_s2] ss:$0 sm:$0xff] (!%p239_p2) }
   0xd   : > { %s1431_s28 = smov (!%p271_p3, %s270_s28), 37 }
   0xe   : > { %s975_s8 = sshll.u32 %s1431_s28, 3 }
   0xf   : > { %s1247_s11 = scalar_lea.vmem %s1422_s0, %s975_s8  ;;  %s1379_s10 = scalar_lea.vmem %s1429_s7, %s975_s8 }
  0x10   : > { %v283_v2 = vld [vmem:[%s1247_s11] sm:$0xff]  ;;  %v284_v3 = vld [vmem:[%s1247_s11 + $0x8] sm:$0xff]  ;;  %v285_v4 = vld [vmem:[%s1247_s11 + $0x10] sm:$0xff] }
  0x11   : > { %v302_v5 = vpack.c.bf16 %v284_v3, %v283_v2  ;;  %v286_v6 = vld [vmem:[%s1247_s11 + $0x18] sm:$0xff]  ;;  %v287_v7 = vld [vmem:[%s1247_s11 + $0x20] sm:$0xff]  ;;  %v288_v8 = vld [vmem:[%s1247_s11 + $0x28] sm:$0xff] }
  0x12   : > { %v303_v9 = vpack.c.bf16 %v286_v6, %v285_v4  ;;  %v304_v10 = vpack.c.bf16 %v288_v8, %v287_v7  ;;  %v289_v11 = vld [vmem:[%s1247_s11 + $0x30] sm:$0xff]  ;;  %v290_v12 = vld [vmem:[%s1247_s11 + $0x38] sm:$0xff]  ;;  %v291_v13 = vld [vmem:[%s1247_s11 + $0x40] sm:$0xff] }
  0x13   : > { %1058 = vmatprep.mubr.msk.bf16.mxu0 %vm327_vm0, %v302_v5  ;;  %v292_v14 = vld [vmem:[%s1247_s11 + $0x48] sm:$0xff]  ;;  %v299_v15 = vld [vmem:[%s1247_s11 + $0x80] sm:$0xff]  ;;  %v301_v19 = vld [vmem:[%s1247_s11 + $0x90] sm:$0xff]  ;;  %v305_v21 = vpack.c.bf16 %v290_v12, %v289_v11 }
  0x14   : > { %1059 = vmatmul.mubr.msk.bf16.vlgmr.msra.gmra.mrb[0].mxu0 %vm327_vm0, %v303_v9  ;;  %v300_v16 = vld [vmem:[%s1247_s11 + $0x88] sm:$0xff]  ;;  %v311_v20 = vpack.c.bf16 %v301_v19, %v301_v19  ;;  %v306_v22 = vpack.c.bf16 %v292_v14, %v291_v13  ;;  %v293_v24 = vld [vmem:[%s1247_s11 + $0x50] sm:$0xff]  ;;  %v294_v25 = vld [vmem:[%s1247_s11 + $0x58] sm:$0xff] }
  0x15   : > { %1062 = vmatprep.mubr.msk.bf16.mxu0 %vm327_vm0, %v304_v10  ;;  %v310_v18 = vpack.c.bf16 %v300_v16, %v299_v15  ;;  %v295_v26 = vld [vmem:[%s1247_s11 + $0x60] sm:$0xff]  ;;  %v296_v27 = vld [vmem:[%s1247_s11 + $0x68] sm:$0xff]  ;;  %v307_v29 = vpack.c.bf16 %v294_v25, %v293_v24  ;;  %v297_v32 = vld [vmem:[%s1247_s11 + $0x70] sm:$0xff]  ;;  %1115 = vmatpush3.bf16.msra.mxu0 %v1169_v38 }
  0x16   : > { %v308_v30 = vpack.c.bf16 %v296_v27, %v295_v26  ;;  %v298_v33 = vld [vmem:[%s1247_s11 + $0x78] sm:$0xff]  ;;  %1116 = vmatprep.subr.bf16.mxu0 %v1170_v39 }
  0x17   : > { %1074 = vmatprep.mubr.msk.bf16.mxu1 %vm327_vm0, %v310_v18  ;;  %v309_v35 = vpack.c.bf16 %v298_v33, %v297_v32 }
  0x18   : > { %1075 = vmatmul.mubr.msk.bf16.vlgmr.msra.gmra.mrb[0].mxu1 %vm327_vm0, %v311_v20 }
  0x19   : > { %1079 = vmatpush3.bf16.msra.mxu1 %v1161_v1  ;;  %1117 = vmatpush3.bf16.msra.mxu0 %v1170_v39 }
  0x1a   : > { %1080 = vmatprep.subr.bf16.mxu1 %v1162_v17  ;;  %1118 = vmatprep.subr.bf16.mxu0 %v1171_v40 }
  0x1c   : > { %1063 = vmatmul.mubr.msk.bf16.gmra.mrb[4].mxu0 %vm327_vm0, %v305_v21 }
  0x1d   : > { %1066 = vmatprep.mubr.msk.bf16.mxu0 %vm327_vm0, %v306_v22  ;;  %1081 = vmatpush3.bf16.msra.mxu1 %v1162_v17 }
  0x1e   : > { %1082 = vmatprep.subr.bf16.mxu1 %v1163_v23  ;;  %1119 = vmatpush3.bf16.msra.mxu0 %v1171_v40 }
  0x1f   : > { %1120 = vmatprep.subr.bf16.mxu0 %v1172_v41 }
  0x21   : > { %1083 = vmatpush3.bf16.msra.mxu1 %v1163_v23 }
  0x22   : > { %1084 = vmatprep.subr.bf16.mxu1 %v1164_v28  ;;  %1121 = vmatpush3.bf16.msra.mxu0 %v1172_v41 }
  0x23   : > { %1122 = vmatprep.subr.bf16.mxu0 %v1173_v42 }
  0x24   : > { %1067 = vmatmul.mubr.msk.bf16.gmra.mrb[8].mxu0 %vm327_vm0, %v307_v29 }
  0x25   : > { %1070 = vmatprep.mubr.msk.bf16.mxu0 %vm327_vm0, %v308_v30  ;;  %1085 = vmatpush3.bf16.msra.mxu1 %v1164_v28 }
  0x26   : > { %1086 = vmatprep.subr.bf16.mxu1 %v1165_v31  ;;  %1123 = vmatpush3.bf16.msra.mxu0 %v1173_v42 }
  0x27   : > { %1124 = vmatprep.subr.bf16.mxu0 %v1174_v43 }
  0x29   : > { %1087 = vmatpush3.bf16.msra.mxu1 %v1165_v31 }
  0x2a   : > { %1088 = vmatprep.subr.bf16.mxu1 %v1166_v34  ;;  %1125 = vmatpush3.bf16.msra.mxu0 %v1174_v43 }
  0x2c   : > { %1071 = vmatmul.mubr.msk.bf16.gmra.mrb[12].mxu0 %vm327_vm0, %v309_v35 }
  0x2d   : > { %1089 = vmatpush3.bf16.msra.mxu1 %v1166_v34 }
  0x2e   : > { %1090 = vmatprep.subr.bf16.mxu1 %v1167_v36 }
  0x31   : > { %1091 = vmatpush3.bf16.msra.mxu1 %v1167_v36 }
  0x32   : > { %1092 = vmatprep.subr.bf16.mxu1 %v1168_v37 }
  0x35   : > { %1093 = vmatpush3.bf16.msra.mxu1 %v1168_v37 }
  0xe7   : > { %v1060_v45 = vpop.f32.mrb[0].mxu0 }
  0xe8   : > { %v401_v46 = vadd.f32 %v1060_v45, %v1320_v44  ;;  %v392_v47 = vpop.f32.mrb[1].mxu0 }
  0xe9   : > { %v393_v48 = vadd.f32 %v1320_v44, %v392_v47  ;;  %v1061_v49 = vpop.f32.mrb[2].mxu0 }
  0xea   : > { %v404_v50 = vadd.f32 %v1061_v49, %v1320_v44  ;;  %v395_v51 = vpop.f32.mrb[3].mxu0  ;;  %v472_v53 = vmax.f32 %v401_v46, 0.0 }
  0xeb   : > { %v396_v52 = vadd.f32 %v1320_v44, %v395_v51  ;;  %v1076_v55 = vpop.f32.mrb[0].mxu1  ;;  %v470_v56 = vmax.f32 %v393_v48, 0.0  ;;  %v1176_v51 = vld [vmem:[%s1427_s5 + $0x38] sm:$0xff]  }
  0xec   : > { %v473_v54 = vmax.f32 %v404_v50, 0.0  ;;  %v456_v58 = vpop.f32.mrb[1].mxu1  ;;  %v465_v47 = vadd.f32 %v1076_v55, %v1320_v44  ;;  %v1175_v50 = vld [vmem:[%s1427_s5 + $0x30] sm:$0xff]  }
  0xed   : > { %v471_v57 = vmax.f32 %v396_v52, 0.0  ;;  %v457_v60 = vadd.f32 %v1320_v44, %v456_v58  ;;  %v1077_v61 = vpop.f32.mrb[2].mxu1  ;;  %1126 = vmatprep.subr.bf16.mxu0 %v1175_v50 }
  0xee   : > { %v490_v59 = vpack.c.bf16 %v473_v54, %v472_v53  ;;  %v459_v0 = vpop.f32.mrb[3].mxu1  ;;  %v488_v48 = vmax.f32 %v465_v47, 0.0  ;;  %1127 = vmatpush3.bf16.msra.mxu0 %v1175_v50 }
  0xef   : > { %v489_v62 = vpack.c.bf16 %v471_v57, %v470_v56  ;;  %v1064_v63 = vpop.f32.mrb[4].mxu0  ;;  %v486_v3 = vmax.f32 %v457_v60, 0.0  ;;  %v460_v4 = vadd.f32 %v1320_v44, %v459_v0  ;;  %1128 = vmatprep.subr.bf16.mxu0 %v1176_v51 }
  0xf0   : > { %v417_v1 = vadd.f32 %v1064_v63, %v1320_v44  ;;  %v408_v2 = vpop.f32.mrb[5].mxu0  ;;  %v498_v49 = vpack.c.bf16 %v488_v48, %v488_v48 }
  0xf1   : > { %v409_v5 = vadd.f32 %v1320_v44, %v408_v2  ;;  %v1065_v6 = vpop.f32.mrb[6].mxu0  ;;  %1094 = vmatprep.mubr.bf16.mxu1 %v489_v62  ;;  %v487_v9 = vmax.f32 %v460_v4, 0.0 }
  0xf2   : > { %v420_v7 = vadd.f32 %v1065_v6, %v1320_v44  ;;  %v411_v8 = vpop.f32.mrb[7].mxu0  ;;  %1095 = vmatmul.mubr.bf16.vlgmr.msra.gmra.mrb[4].mxu1 %v490_v59  ;;  %v476_v11 = vmax.f32 %v417_v1, 0.0  ;;  %1129 = vmatpush3.bf16.msra.mxu0 %v1176_v51 }
  0xf3   : > { %v412_v10 = vadd.f32 %v1320_v44, %v411_v8  ;;  %v497_v13 = vpack.c.bf16 %v487_v9, %v486_v3  ;;  %v474_v14 = vmax.f32 %v409_v5, 0.0 }
  0xf4   : > { %v477_v12 = vmax.f32 %v420_v7, 0.0 }
  0xf5   : > { %v475_v15 = vmax.f32 %v412_v10, 0.0 }
  0xf6   : > { %v492_v16 = vpack.c.bf16 %v477_v12, %v476_v11 }
  0xf7   : > { %v491_v17 = vpack.c.bf16 %v475_v15, %v474_v14  ;;  %v1068_v18 = vpop.f32.mrb[8].mxu0 }
  0xf8   : > { %v433_v19 = vadd.f32 %v1068_v18, %v1320_v44  ;;  %v424_v20 = vpop.f32.mrb[9].mxu0 }
  0xf9   : > { %v425_v21 = vadd.f32 %v1320_v44, %v424_v20  ;;  %v1069_v22 = vpop.f32.mrb[10].mxu0  ;;  %1098 = vmatprep.mubr.bf16.mxu1 %v491_v17 }
  0xfa   : > { %v436_v23 = vadd.f32 %v1069_v22, %v1320_v44  ;;  %v427_v24 = vpop.f32.mrb[11].mxu0  ;;  %1099 = vmatmul.mubr.bf16.gmra.mrb[8].mxu1 %v492_v16  ;;  %v480_v26 = vmax.f32 %v433_v19, 0.0 }
  0xfb   : > { %v428_v25 = vadd.f32 %v1320_v44, %v427_v24  ;;  %v478_v28 = vmax.f32 %v425_v21, 0.0 }
  0xfc   : > { %v481_v27 = vmax.f32 %v436_v23, 0.0 }
  0xfd   : > { %v479_v29 = vmax.f32 %v428_v25, 0.0 }
  0xfe   : > { %v494_v30 = vpack.c.bf16 %v481_v27, %v480_v26 }
  0xff   : > { %v493_v31 = vpack.c.bf16 %v479_v29, %v478_v28  ;;  %v1072_v32 = vpop.f32.mrb[12].mxu0 }
 0x100   : > { %v449_v33 = vadd.f32 %v1072_v32, %v1320_v44  ;;  %v440_v34 = vpop.f32.mrb[13].mxu0 }
 0x101   : > { %v441_v35 = vadd.f32 %v1320_v44, %v440_v34  ;;  %v1073_v36 = vpop.f32.mrb[14].mxu0  ;;  %1102 = vmatprep.mubr.bf16.mxu1 %v493_v31 }
 0x102   : > { %v452_v37 = vadd.f32 %v1073_v36, %v1320_v44  ;;  %v443_v38 = vpop.f32.mrb[15].mxu0  ;;  %1103 = vmatmul.mubr.bf16.gmra.mrb[12].mxu1 %v494_v30  ;;  %v484_v40 = vmax.f32 %v449_v33, 0.0 }
 0x103   : > { %v444_v39 = vadd.f32 %v1320_v44, %v443_v38  ;;  %v482_v42 = vmax.f32 %v441_v35, 0.0  ;;  %v1350_v44 = vld [vmem:[%s1426_s4] ss:$0 sm:$0xff] }
 0x104   : > { %v485_v41 = vmax.f32 %v452_v37, 0.0 }
 0x105   : > { %v483_v43 = vmax.f32 %v444_v39, 0.0 }
 0x106   : > { %v496_v45 = vpack.c.bf16 %v485_v41, %v484_v40 }
 0x107   : > { %v495_v46 = vpack.c.bf16 %v483_v43, %v482_v42 }
 0x109   : > { %1106 = vmatprep.mubr.bf16.mxu1 %v495_v46 }
 0x10a   : > { %1107 = vmatmul.mubr.bf16.gmra.mrb[16].mxu1 %v496_v45 }
 0x10b   : > { %1110 = vmatprep.mubr.bf16.mxu1 %v497_v13 }
 0x112   : > { %1111 = vmatmul.mubr.bf16.gmra.mrb[20].mxu1 %v498_v49 }
 0x1c5   : > { %v1096_v52 = vpop.f32.mrb[4].mxu1 }
 0x1c6   : > { %v613_v53 = vadd.f32 %v1096_v52, %v1350_v44  ;;  %v604_v54 = vpop.f32.mrb[5].mxu1 }
 0x1c7   : > { %v605_v55 = vadd.f32 %v1350_v44, %v604_v54  ;;  %v1097_v56 = vpop.f32.mrb[6].mxu1 }
 0x1c8   : > { %v616_v57 = vadd.f32 %v1097_v56, %v1350_v44  ;;  %v607_v58 = vpop.f32.mrb[7].mxu1  ;;  %v684_v60 = vmax.f32 %v613_v53, 0.0 }
 0x1c9   : > { %v608_v59 = vadd.f32 %v1350_v44, %v607_v58  ;;  %v682_v62 = vmax.f32 %v605_v55, 0.0 }
 0x1ca   : > { %v685_v61 = vmax.f32 %v616_v57, 0.0  ;;  %v998_v57 = vld [vmem:[%s1428_s6] ss:$0 sm:$0xff] }
 0x1cb   : > { %v683_v63 = vmax.f32 %v608_v59, 0.0 }
 0x1cc   : > { %v702_v0 = vpack.c.bf16 %v685_v61, %v684_v60 }
 0x1cd   : > { %v701_v1 = vpack.c.bf16 %v683_v63, %v682_v62  ;;  %v1100_v2 = vpop.f32.mrb[8].mxu1 }
 0x1ce   : > { %v629_v3 = vadd.f32 %v1100_v2, %v1350_v44  ;;  %v620_v4 = vpop.f32.mrb[9].mxu1 }
 0x1cf   : > { %v621_v5 = vadd.f32 %v1350_v44, %v620_v4  ;;  %v1101_v6 = vpop.f32.mrb[10].mxu1  ;;  %1130 = vmatprep.mubr.bf16.mxu0 %v701_v1 }
 0x1d0   : > { %v632_v7 = vadd.f32 %v1101_v6, %v1350_v44  ;;  %v623_v8 = vpop.f32.mrb[11].mxu1  ;;  %1131 = vmatmul.mubr.bf16.vlgmr.msra.gmra.mrb[16].mxu0 %v702_v0  ;;  %v688_v10 = vmax.f32 %v629_v3, 0.0 }
 0x1d1   : > { %v624_v9 = vadd.f32 %v1350_v44, %v623_v8  ;;  %v686_v12 = vmax.f32 %v621_v5, 0.0 }
 0x1d2   : > { %v689_v11 = vmax.f32 %v632_v7, 0.0 }
 0x1d3   : > { %v687_v13 = vmax.f32 %v624_v9, 0.0 }
 0x1d4   : > { %v704_v14 = vpack.c.bf16 %v689_v11, %v688_v10 }
 0x1d5   : > { %v703_v15 = vpack.c.bf16 %v687_v13, %v686_v12  ;;  %v1104_v16 = vpop.f32.mrb[12].mxu1 }
 0x1d6   : > { %v645_v17 = vadd.f32 %v1104_v16, %v1350_v44  ;;  %v636_v18 = vpop.f32.mrb[13].mxu1 }
 0x1d7   : > { %v637_v19 = vadd.f32 %v1350_v44, %v636_v18  ;;  %v1105_v20 = vpop.f32.mrb[14].mxu1  ;;  %1134 = vmatprep.mubr.bf16.mxu0 %v703_v15 }
 0x1d8   : > { %v648_v21 = vadd.f32 %v1105_v20, %v1350_v44  ;;  %v639_v22 = vpop.f32.mrb[15].mxu1  ;;  %1135 = vmatmul.mubr.bf16.gmra.mrb[20].mxu0 %v704_v14  ;;  %v692_v24 = vmax.f32 %v645_v17, 0.0 }
 0x1d9   : > { %v640_v23 = vadd.f32 %v1350_v44, %v639_v22  ;;  %v690_v26 = vmax.f32 %v637_v19, 0.0 }
 0x1da   : > { %v693_v25 = vmax.f32 %v648_v21, 0.0 }
 0x1db   : > { %v691_v27 = vmax.f32 %v640_v23, 0.0 }
 0x1dc   : > { %v706_v28 = vpack.c.bf16 %v693_v25, %v692_v24 }
 0x1dd   : > { %v705_v29 = vpack.c.bf16 %v691_v27, %v690_v26  ;;  %v1108_v30 = vpop.f32.mrb[16].mxu1 }
 0x1de   : > { %v661_v31 = vadd.f32 %v1108_v30, %v1350_v44  ;;  %v652_v32 = vpop.f32.mrb[17].mxu1 }
 0x1df   : > { %v653_v33 = vadd.f32 %v1350_v44, %v652_v32  ;;  %v1109_v34 = vpop.f32.mrb[18].mxu1  ;;  %1138 = vmatprep.mubr.bf16.mxu0 %v705_v29 }
 0x1e0   : > { %v664_v35 = vadd.f32 %v1109_v34, %v1350_v44  ;;  %v655_v36 = vpop.f32.mrb[19].mxu1  ;;  %1139 = vmatmul.mubr.bf16.gmra.mrb[24].mxu0 %v706_v28  ;;  %v696_v38 = vmax.f32 %v661_v31, 0.0 }
 0x1e1   : > { %v656_v37 = vadd.f32 %v1350_v44, %v655_v36  ;;  %v694_v40 = vmax.f32 %v653_v33, 0.0 }
 0x1e2   : > { %v697_v39 = vmax.f32 %v664_v35, 0.0 }
 0x1e3   : > { %v695_v41 = vmax.f32 %v656_v37, 0.0 }
 0x1e4   : > { %v708_v42 = vpack.c.bf16 %v697_v39, %v696_v38 }
 0x1e5   : > { %v707_v43 = vpack.c.bf16 %v695_v41, %v694_v40  ;;  %v1112_v45 = vpop.f32.mrb[20].mxu1 }
 0x1e6   : > { %v677_v46 = vadd.f32 %v1112_v45, %v1350_v44  ;;  %v668_v47 = vpop.f32.mrb[21].mxu1 }
 0x1e7   : > { %v669_v48 = vadd.f32 %v1350_v44, %v668_v47  ;;  %v1113_v49 = vpop.f32.mrb[22].mxu1  ;;  %1142 = vmatprep.mubr.bf16.mxu0 %v707_v43 }
 0x1e8   : > { %v671_v50 = vpop.f32.mrb[23].mxu1  ;;  %1143 = vmatmul.mubr.bf16.gmra.mrb[28].mxu0 %v708_v42  ;;  %v700_v52 = vmax.f32 %v677_v46, 0.0 }
 0x1e9   : > { %v672_v51 = vadd.f32 %v1350_v44, %v671_v50  ;;  %v698_v53 = vmax.f32 %v669_v48, 0.0 }
 0x1ea   : > { %v710_v56 = vpack.c.bf16 %v700_v52, %v700_v52 }
 0x1eb   : > { %v699_v54 = vmax.f32 %v672_v51, 0.0 }
 0x1ed   : > { %v709_v55 = vpack.c.bf16 %v699_v54, %v698_v53 }
 0x1ef   : > { %1146 = vmatprep.mubr.bf16.mxu0 %v709_v55 }
 0x1f0   : > { %1147 = vmatmul.mubr.bf16.gmra.mrb[32].mxu0 %v710_v56 }
 0x2a3   : > { %v1132_v44 = vpop.f32.mrb[16].mxu0 }
 0x2a4   : > { %v825_v58 = vadd.f32 %v1132_v44, %v998_v57  ;;  %v816_v59 = vpop.f32.mrb[17].mxu0 }
 0x2a5   : > { %v817_v60 = vadd.f32 %v998_v57, %v816_v59  ;;  %v1133_v61 = vpop.f32.mrb[18].mxu0 }
 0x2a6   : > { %897 = vst.msk [vmem:[%s1379_s10 + $0x10] sm:$0xff] %vm894_vm1, %v825_v58  ;;  %v828_v62 = vadd.f32 %v1133_v61, %v998_v57  ;;  %v819_v63 = vpop.f32.mrb[19].mxu0 }
 0x2a7   : > { %895 = vst.msk [vmem:[%s1379_s10] sm:$0xff] %vm894_vm1, %v817_v60  ;;  %v820_v0 = vadd.f32 %v998_v57, %v819_v63 }
 0x2a8   : > { %898 = vst.msk [vmem:[%s1379_s10 + $0x18] sm:$0xff] %vm894_vm1, %v828_v62 }
 0x2a9   : > { %896 = vst.msk [vmem:[%s1379_s10 + $0x8] sm:$0xff] %vm894_vm1, %v820_v0 }
 0x2ab   : > { %v1136_v1 = vpop.f32.mrb[20].mxu0 }
 0x2ac   : > { %v841_v2 = vadd.f32 %v1136_v1, %v998_v57  ;;  %v832_v3 = vpop.f32.mrb[21].mxu0 }
 0x2ad   : > { %v833_v4 = vadd.f32 %v998_v57, %v832_v3  ;;  %v1137_v5 = vpop.f32.mrb[22].mxu0 }
 0x2ae   : > { %901 = vst.msk [vmem:[%s1379_s10 + $0x30] sm:$0xff] %vm894_vm1, %v841_v2  ;;  %v844_v6 = vadd.f32 %v1137_v5, %v998_v57  ;;  %v835_v7 = vpop.f32.mrb[23].mxu0 }
 0x2af   : > { %899 = vst.msk [vmem:[%s1379_s10 + $0x20] sm:$0xff] %vm894_vm1, %v833_v4  ;;  %v836_v8 = vadd.f32 %v998_v57, %v835_v7 }
 0x2b0   : > { %902 = vst.msk [vmem:[%s1379_s10 + $0x38] sm:$0xff] %vm894_vm1, %v844_v6 }
 0x2b1   : > { %900 = vst.msk [vmem:[%s1379_s10 + $0x28] sm:$0xff] %vm894_vm1, %v836_v8 }
 0x2b3   : > { %v1140_v9 = vpop.f32.mrb[24].mxu0 }
 0x2b4   : > { %v857_v10 = vadd.f32 %v1140_v9, %v998_v57  ;;  %v848_v11 = vpop.f32.mrb[25].mxu0 }
 0x2b5   : > { %v849_v12 = vadd.f32 %v998_v57, %v848_v11  ;;  %v1141_v13 = vpop.f32.mrb[26].mxu0 }
 0x2b6   : > { %905 = vst.msk [vmem:[%s1379_s10 + $0x50] sm:$0xff] %vm894_vm1, %v857_v10  ;;  %v860_v14 = vadd.f32 %v1141_v13, %v998_v57  ;;  %v851_v15 = vpop.f32.mrb[27].mxu0 }
 0x2b7   : > { %903 = vst.msk [vmem:[%s1379_s10 + $0x40] sm:$0xff] %vm894_vm1, %v849_v12  ;;  %v852_v16 = vadd.f32 %v998_v57, %v851_v15 }
 0x2b8   : > { %906 = vst.msk [vmem:[%s1379_s10 + $0x58] sm:$0xff] %vm894_vm1, %v860_v14 }
 0x2b9   : > { %904 = vst.msk [vmem:[%s1379_s10 + $0x48] sm:$0xff] %vm894_vm1, %v852_v16 }
 0x2bb   : > { %v1144_v17 = vpop.f32.mrb[28].mxu0 }
 0x2bc   : > { %v873_v18 = vadd.f32 %v1144_v17, %v998_v57  ;;  %v864_v19 = vpop.f32.mrb[29].mxu0 }
 0x2bd   : > { %v865_v20 = vadd.f32 %v998_v57, %v864_v19  ;;  %v1145_v21 = vpop.f32.mrb[30].mxu0 }
 0x2be   : > { %909 = vst.msk [vmem:[%s1379_s10 + $0x70] sm:$0xff] %vm894_vm1, %v873_v18  ;;  %v876_v22 = vadd.f32 %v1145_v21, %v998_v57  ;;  %v867_v23 = vpop.f32.mrb[31].mxu0 }
 0x2bf   : > { %907 = vst.msk [vmem:[%s1379_s10 + $0x60] sm:$0xff] %vm894_vm1, %v865_v20  ;;  %v868_v24 = vadd.f32 %v998_v57, %v867_v23 }
 0x2c0   : > { %910 = vst.msk [vmem:[%s1379_s10 + $0x78] sm:$0xff] %vm894_vm1, %v876_v22 }
 0x2c1   : > { %908 = vst.msk [vmem:[%s1379_s10 + $0x68] sm:$0xff] %vm894_vm1, %v868_v24 }
 0x2c3   : > { %v1148_v25 = vpop.f32.mrb[32].mxu0 }
 0x2c4   : > { %v889_v26 = vadd.f32 %v1148_v25, %v998_v57  ;;  %v880_v27 = vpop.f32.mrb[33].mxu0 }
 0x2c5   : > { %v881_v28 = vadd.f32 %v998_v57, %v880_v27  ;;  %v1149_v29 = vpop.f32.mrb[34].mxu0 }
 0x2c6   : > { %913 = vst.msk [vmem:[%s1379_s10 + $0x90] sm:$0xff] %vm894_vm1, %v889_v26  ;;  %v883_v30 = vpop.f32.mrb[35].mxu0 }
 0x2c7   : > { %911 = vst.msk [vmem:[%s1379_s10 + $0x80] sm:$0xff] %vm894_vm1, %v881_v28  ;;  %v884_v31 = vadd.f32 %v998_v57, %v883_v30 }
 0x2c9   : > { %912 = vst.msk [vmem:[%s1379_s10 + $0x88] sm:$0xff] %vm894_vm1, %v884_v31 }
 0x2ca PF: > { %s17_s24 = sadd.s32 1, %s1183_s24  }
 0x2cb   : > { %p14_p4 = scmp.ge.s32.totalorder %s17_s24, 4  }
 0x2cd   :  { %16 = sbr.rel (!%p14_p4) target bundleno = 1 (0x1), region = 78 }

</bundles_post_ra>
